<compile_context>
chip_gen: v6e
topology: v6e:2x2x1
jax: 0.10.0
libtpu: 0.0.40
codegen_flags: <defaults>
</compile_context>

<pallas_src>
import functools
import math

import jax
import jax.numpy as jnp
from jax import lax
from jax.experimental import pallas as pl
from jax.experimental.pallas import tpu as pltpu

EPS = 1e-08              # entropy clamp (matches the PyTorch module)
NORM_EPS = 1e-12         # F.normalize eps
NORM_EPS_SQ = NORM_EPS * NORM_EPS


def _round_up(x, m):
    return ((x + m - 1) // m) * m


# --------------------------------------------------------------------------- #
# Kernel 1: streaming batch reduction (per-split partial accumulators).
# --------------------------------------------------------------------------- #
def _scan_stream_kernel(anchors_ref, neighbors_ref,
                        s_ref, asum_ref, asq_ref, psq_ref, scal_ref,
                        *, b, inv_tau):
    p = pl.program_id(0)                 # core-split index ("parallel")
    j = pl.program_id(1)                 # batch-tile step within the split
    sps = pl.num_programs(1)
    tm = anchors_ref.shape[0]
    c = anchors_ref.shape[1]

    @pl.when(j == 0)
    def _init():
        s_ref[...] = jnp.zeros_like(s_ref)
        asum_ref[...] = jnp.zeros_like(asum_ref)
        asq_ref[...] = jnp.zeros_like(asq_ref)
        psq_ref[...] = jnp.zeros_like(psq_ref)
        scal_ref[...] = jnp.zeros_like(scal_ref)

    # Global rows handled by this (p, j) step.  Tail rows of the last (partial)
    # tile and fully-clamped duplicate tiles are masked out; the raw data is
    # zero-sanitized *before* any arithmetic so garbage tail rows cannot create
    # NaN/Inf that would leak through masked sums.
    tile = p * sps + j
    row = tile * tm + lax.broadcasted_iota(jnp.int32, (tm, 1), 0)
    valid_b = row < b                                        # [tm, 1] bool
    valid = valid_b.astype(jnp.float32)

    a = jnp.where(valid_b, anchors_ref[...].astype(jnp.float32), 0.0)   # [tm, c]
    n = jnp.where(valid_b, neighbors_ref[...].astype(jnp.float32), 0.0)

    # Row softmax in f32.
    ea = jnp.exp(a - jnp.max(a, axis=1, keepdims=True))
    ap = ea / jnp.sum(ea, axis=1, keepdims=True)
    en = jnp.exp(n - jnp.max(n, axis=1, keepdims=True))
    pp = en / jnp.sum(en, axis=1, keepdims=True)

    # Consistency pieces: log of the per-row prob dot.
    log_dot = jnp.log(jnp.sum(ap * pp, axis=1, keepdims=True))          # [tm,1]
    vlog = valid * log_dot

    # w = exp(-||a/||a|| - n/||n||||^2 / tau) via the cosine identity:
    #   ||a_nl - n_nl||^2 = 2 - 2 * (a.n) * rsqrt(sum a^2) * rsqrt(sum n^2)
    dot_an = jnp.sum(a * n, axis=1, keepdims=True)
    inv_na = lax.rsqrt(jnp.maximum(jnp.sum(a * a, axis=1, keepdims=True),
                                   NORM_EPS_SQ))
    inv_nn = lax.rsqrt(jnp.maximum(jnp.sum(n * n, axis=1, keepdims=True),
                                   NORM_EPS_SQ))
    w = jnp.exp((2.0 * dot_an * inv_na * inv_nn - 2.0) * inv_tau)       # [tm,1]

    sl = jnp.sum(vlog, axis=0, keepdims=True)                           # (1,1)
    swl = jnp.sum(w * vlog, axis=0, keepdims=True)                      # (1,1)

    ap_m = ap * valid
    pp_m = pp * valid

    # Single batch-contracted Gram on the MXU (TN contraction, no transpose).
    tn = (((0,), (0,)), ((), ()))
    s_ref[...] += lax.dot_general(ap_m, pp_m, tn,
                                  preferred_element_type=jnp.float32)[None]
    asum_ref[...] += jnp.sum(ap_m, axis=0, keepdims=True)[None]          # (1,1,c)
    asq_ref[...] += jnp.sum(ap_m * ap_m, axis=0, keepdims=True)[None]    # (1,1,c)
    psq_ref[...] += jnp.sum(pp_m * pp_m, axis=0, keepdims=True)[None]    # (1,1,c)

    # Lane-packed scalar accumulators: lane 0 = sum log(p.q), lane 1 = sum w*log.
    lane = lax.broadcasted_iota(jnp.int32, (1, 128), 1)
    scal_ref[...] += (jnp.where(lane == 0, sl, 0.0)
                      + jnp.where(lane == 1, swl, 0.0))[None]


# --------------------------------------------------------------------------- #
# Kernel 2: tiny grid-less C x C finalize (combines split partials).
# --------------------------------------------------------------------------- #
def _scan_finalize_kernel(s_ref, asum_ref, asq_ref, psq_ref, scal_ref, gama_ref,
                          losses_ref, gama_out_ref,
                          *, b, use_w, wo1, wo2, wo3, u, entropy_weight, kpa):
    c = gama_ref.shape[0]
    inv_b = 1.0 / float(b)

    S = jnp.sum(s_ref[...], axis=0)                       # (c, c)
    col_a_sum = jnp.sum(asum_ref[...], axis=0)            # (1, c)
    col_a_sq = jnp.sum(asq_ref[...], axis=0)              # (1, c)
    col_p_sq = jnp.sum(psq_ref[...], axis=0)              # (1, c)
    scal = jnp.sum(scal_ref[...], axis=0)                 # (1, 128)

    lane = lax.broadcasted_iota(jnp.int32, (1, 128), 1)
    sum_log = jnp.sum(jnp.where(lane == 0, scal, 0.0), axis=1, keepdims=True)
    sum_wlog = jnp.sum(jnp.where(lane == 1, scal, 0.0), axis=1, keepdims=True)

    rr = lax.broadcasted_iota(jnp.int32, (c, c), 0)
    cc = lax.broadcasted_iota(jnp.int32, (c, c), 1)
    is_diag = rr == cc

    # Anchor column norms as a column vector: one-shot (1,c)->(c,1) relayout via
    # diag-mask + row reduce (cheap XLU work, executed once).
    na_sq_col = jnp.sum(jnp.where(is_diag, col_a_sq, 0.0),
                        axis=1, keepdims=True)                            # (c,1)
    inv_na_col = lax.rsqrt(jnp.maximum(na_sq_col, NORM_EPS_SQ))           # (c,1)
    inv_np_row = lax.rsqrt(jnp.maximum(col_p_sq, NORM_EPS_SQ))            # (1,c)

    # Column-normalized prob correlation, exponentiated.
    E = jnp.exp(S * inv_na_col * inv_np_row)                              # (c,c)

    numer = jnp.sum(jnp.where(is_diag, E, 0.0), axis=1, keepdims=True)    # (c,1)
    gama_new = (kpa * gama_ref[...].astype(jnp.float32)
                + (1.0 - kpa) * E) * (1.0 / math.e)                       # (c,c)
    rowsum = jnp.sum(gama_new * jnp.where(is_diag, 0.0, E),
                     axis=1, keepdims=True)                               # (c,1)
    contr = -jnp.sum(jnp.log(numer) - jnp.log(rowsum),
                     axis=(0, 1), keepdims=True) / jnp.float32(c)         # (1,1)

    # Entropy of the mean anchor distribution.
    p = jnp.maximum(col_a_sum * inv_b, EPS)
    ent = -jnp.sum(p * jnp.log(p), axis=(0, 1), keepdims=True)            # (1,1)

    # Consistency (static python branch keyed on the boolean epoch >= 130 only).
    cons = (-sum_wlog if use_w else -sum_log) * inv_b                     # (1,1)

    l_cons = wo1 * cons
    l_contr = (wo2 * u) * contr
    l_ent = (wo3 * entropy_weight) * ent
    total = l_cons + l_contr - l_ent

    losses_ref[...] = (jnp.where(lane == 0, total, 0.0)
                       + jnp.where(lane == 1, l_cons, 0.0)
                       + jnp.where(lane == 2, l_contr, 0.0)
                       + jnp.where(lane == 3, l_ent, 0.0))
    gama_out_ref[...] = gama_new


# --------------------------------------------------------------------------- #
# Wrapper
# --------------------------------------------------------------------------- #
def scan_loss(anchors, neighbors, gama_prev, epoch, *, wo1, wo2, wo3, t, u,
              entropy_weight=5.0, kpa=0.5, block_rows=None, num_splits=None):
    """anchors/neighbors: [b, num_classes] logits; gama_prev: [C, C] EMA state.

    Returns (total, wo1*consistency, wo2*u*contrastive, wo3*entropy_weight*entropy,
             gama_new) -- matching SCANLoss.forward (the module's self.gama state is
             handled functionally).
    """
    b, c = anchors.shape
    in_itemsize = max(anchors.dtype.itemsize, neighbors.dtype.itemsize)
    c_lanes = _round_up(c, 128)

    if block_rows is None:
        # Keep (2 inputs x 2 pipeline buffers) + ~8 f32 temporaries under ~10 MiB.
        per_row = c_lanes * (2 * 2 * in_itemsize + 8 * 4)
        tm_cap = max(8, ((10 * 1024 * 1024) // per_row) // 8 * 8)
        tm = int(min(1024, tm_cap, _round_up(b, 8)))
    else:
        tm = _round_up(int(block_rows), 8)

    n_tiles = pl.cdiv(b, tm)
    if num_splits is None:
        # Two splits let v7x's second TensorCore take half the batch; on v5e/v6e
        # the "parallel" axis simply serializes (same total work).
        num_splits = 2 if n_tiles >= 2 else 1
    num_splits = int(max(1, min(int(num_splits), n_tiles)))
    sps = pl.cdiv(n_tiles, num_splits)

    def x_map(p, j):
        # Clamp tiles past the end to the last real tile; the kernel masks them
        # out entirely via the validity mask (no host-side padding copy needed).
        return (jnp.minimum(p * sps + j, n_tiles - 1), 0)

    # Actual VMEM footprint estimate; only override the scoped limit when the
    # default would not suffice (never request v7x's entire 64 MiB).
    c_sub = _round_up(c, 8)
    est = (2 * 2 * tm * c_lanes * in_itemsize            # streamed input tiles
           + 8 * tm * c_lanes * 4                        # f32 temporaries
           + 2 * (c_sub * c_lanes + 3 * 8 * c_lanes + 8 * 128) * 4  # partial outs
           + (1 << 20))
    cp_kwargs = dict(dimension_semantics=("parallel", "arbitrary"))
    if est > (16 * 1024 * 1024):
        cp_kwargs["vmem_limit_bytes"] = int(min(est, 48 * 1024 * 1024))

    stream = functools.partial(_scan_stream_kernel, b=b, inv_tau=1.0 / float(t))
    s_part, asum_part, asq_part, psq_part, scal_part = pl.pallas_call(
        stream,
        out_shape=(
            jax.ShapeDtypeStruct((num_splits, c, c), jnp.float32),
            jax.ShapeDtypeStruct((num_splits, 1, c), jnp.float32),
            jax.ShapeDtypeStruct((num_splits, 1, c), jnp.float32),
            jax.ShapeDtypeStruct((num_splits, 1, c), jnp.float32),
            jax.ShapeDtypeStruct((num_splits, 1, 128), jnp.float32),
        ),
        grid_spec=pltpu.PrefetchScalarGridSpec(
            num_scalar_prefetch=0,
            grid=(num_splits, sps),
            in_specs=(
                pl.BlockSpec((tm, c), x_map),
                pl.BlockSpec((tm, c), x_map),
            ),
            out_specs=(
                pl.BlockSpec((1, c, c), lambda p, j: (p, 0, 0)),
                pl.BlockSpec((1, 1, c), lambda p, j: (p, 0, 0)),
                pl.BlockSpec((1, 1, c), lambda p, j: (p, 0, 0)),
                pl.BlockSpec((1, 1, c), lambda p, j: (p, 0, 0)),
                pl.BlockSpec((1, 1, 128), lambda p, j: (p, 0, 0)),
            ),
        ),
        compiler_params=pltpu.CompilerParams(**cp_kwargs),
    )(anchors, neighbors)

    fin = functools.partial(
        _scan_finalize_kernel, b=b, use_w=bool(epoch >= 130),
        wo1=float(wo1), wo2=float(wo2), wo3=float(wo3), u=float(u),
        entropy_weight=float(entropy_weight), kpa=float(kpa))
    losses, gama_new = pl.pallas_call(
        fin,
        out_shape=(jax.ShapeDtypeStruct((1, 128), jnp.float32),
                   jax.ShapeDtypeStruct((c, c), jnp.float32)),
    )(s_part, asum_part, asq_part, psq_part, scal_part,
      gama_prev.astype(jnp.float32))

    return losses[0, 0], losses[0, 1], losses[0, 2], losses[0, 3], gama_new


# --------------------------------------------------------------------------- #
# Plain-JAX reference mirroring the PyTorch forward exactly.
# --------------------------------------------------------------------------- #
def _scan_loss_ref(anchors, neighbors, gama_prev, epoch, *, wo1, wo2, wo3, t, u,
                   entropy_weight=5.0, kpa=0.5):
    b, c = anchors.shape
    ap = jax.nn.softmax(anchors, axis=1)
    pp = jax.nn.softmax(neighbors, axis=1)
    a_nl = anchors / jnp.linalg.norm(anchors, axis=1, keepdims=True)
    n_nl = neighbors / jnp.linalg.norm(neighbors, axis=1, keepdims=True)
    w = jnp.exp(-jnp.sum((a_nl - n_nl) ** 2, axis=1) / t)
    sim_rows = jnp.sum(ap * pp, axis=1)
    if epoch < 130:
        cons = -jnp.sum(jnp.log(sim_rows)) / b
    else:
        cons = -jnp.sum(w * jnp.log(sim_rows)) / b
    na = jnp.maximum(jnp.linalg.norm(ap, axis=0, keepdims=True), NORM_EPS)
    npn = jnp.maximum(jnp.linalg.norm(pp, axis=0, keepdims=True), NORM_EPS)
    S = jnp.matmul((ap / na).T, pp / npn, precision=jax.lax.Precision.HIGHEST)
    E = jnp.exp(S)
    numer = jnp.diag(E)
    gama_new = (kpa * gama_prev + (1.0 - kpa) * E) / math.e
    sim2 = gama_new * (E - jnp.diag(numer))
    contr = -jnp.sum(jnp.log(numer / jnp.sum(sim2, axis=1))) / c
    p = jnp.maximum(jnp.mean(ap, axis=0), EPS)
    ent = -jnp.sum(p * jnp.log(p))
    l_cons = wo1 * cons
    l_contr = wo2 * u * contr
    l_ent = wo3 * entropy_weight * ent
    total = l_cons + l_contr - l_ent
    return total, l_cons, l_contr, l_ent, gama_new


if __name__ == "__main__":
    key = jax.random.PRNGKey(0)
    b, c = 12, 10   # small: batch=12, num_classes=10
    k1, k2 = jax.random.split(key)
    anchors = jax.random.normal(k1, (b, c), dtype=jnp.float32)
    neighbors = anchors + 0.25 * jax.random.normal(k2, (b, c), dtype=jnp.float32)

    hp = dict(wo1=1.0, wo2=1.0, wo3=1.0, t=0.5, u=1.0, entropy_weight=5.0, kpa=0.5)
    gama0 = jnp.full((c, c), math.e, dtype=jnp.float32)   # initial self.gama = exp(1)

    # epoch < 130 branch; small tiles -> exercises the 2-way core split plus a
    # masked partial tail tile (b=12 with tm=8, no host-side padding).
    out1 = jax.block_until_ready(
        scan_loss(anchors, neighbors, gama0, epoch=10, block_rows=8, **hp))
    ref1 = _scan_loss_ref(anchors, neighbors, gama0, epoch=10, **hp)

    # epoch >= 130 (weighted) branch; single split -> exercises the multi-step
    # batch accumulation path, feeding the updated gama state back in.
    out2 = jax.block_until_ready(
        scan_loss(anchors, neighbors, out1[4], epoch=150, block_rows=8,
                  num_splits=1, **hp))
    ref2 = _scan_loss_ref(anchors, neighbors, ref1[4], epoch=150, **hp)

    # Default (auto) tiling path.
    out3 = jax.block_until_ready(
        scan_loss(anchors, neighbors, gama0, epoch=10, **hp))

    for got, want in zip(out1[:4] + out2[:4] + out3[:4],
                         ref1[:4] + ref2[:4] + ref1[:4]):
        assert jnp.allclose(got, want, rtol=1e-3, atol=1e-3), (got, want)
    assert jnp.allclose(out1[4], ref1[4], rtol=1e-3, atol=1e-3)
    assert jnp.allclose(out2[4], ref2[4], rtol=1e-3, atol=1e-3)
    assert jnp.allclose(out3[4], ref1[4], rtol=1e-3, atol=1e-3)
    print("KERNEL_OK")
</pallas_src>

<mosaic_0001>
module attributes {stable_mosaic.version = 11 : i64} {
  func.func @_scan_stream_kernel(%arg0: i32, %arg1: i32, %arg2: memref<8x10xf32, #tpu.memory_space<vmem>>, %arg3: memref<8x10xf32, #tpu.memory_space<vmem>>, %arg4: memref<1x10x10xf32, #tpu.memory_space<vmem>>, %arg5: memref<1x1x10xf32, #tpu.memory_space<vmem>>, %arg6: memref<1x1x10xf32, #tpu.memory_space<vmem>>, %arg7: memref<1x1x10xf32, #tpu.memory_space<vmem>>, %arg8: memref<1x1x128xf32, #tpu.memory_space<vmem>>) attributes {dimension_semantics = [#tpu.dimension_semantics<parallel>, #tpu.dimension_semantics<arbitrary>], iteration_bounds = array<i64: 2, 1>, scalar_prefetch = 0 : i64, scratch_operands = 0 : i64, tpu.core_type = #tpu.core_type<tc>, window_params = [{transform_indices = @transform_0, window_bounds = array<i64: 8, 10>}, {transform_indices = @transform_1, window_bounds = array<i64: 8, 10>}, {transform_indices = @transform_2, window_bounds = array<i64: 1, 10, 10>}, {transform_indices = @transform_3, window_bounds = array<i64: 1, 1, 10>}, {transform_indices = @transform_4, window_bounds = array<i64: 1, 1, 10>}, {transform_indices = @transform_5, window_bounds = array<i64: 1, 1, 10>}, {transform_indices = @transform_6, window_bounds = array<i64: 1, 1, 128>}]} {
    %c0_i32 = arith.constant 0 : i32
    %0 = arith.cmpi eq, %arg1, %c0_i32 : i32
    %1 = arith.extui %0 : i1 to i32
    %c0_i32_0 = arith.constant 0 : i32
    %2 = arith.cmpi ne, %1, %c0_i32_0 : i32
    scf.if %2 {
      %cst_58 = arith.constant 0.000000e+00 : f32
      %122 = vector.broadcast %cst_58 : f32 to vector<1x10x10xf32>
      %c0_59 = arith.constant 0 : index
      %c0_60 = arith.constant 0 : index
      %c0_61 = arith.constant 0 : index
      %123 = vector.load %arg4[%c0_59, %c0_60, %c0_61] : memref<1x10x10xf32, #tpu.memory_space<vmem>>, vector<1x10x10xf32>
      tpu.vector_store %arg4[%c0_59, %c0_60, %c0_61], %122 {strides = array<i32>} : memref<1x10x10xf32, #tpu.memory_space<vmem>>, vector<1x10x10xf32>,
      %cst_62 = arith.constant 0.000000e+00 : f32
      %124 = vector.broadcast %cst_62 : f32 to vector<1x1x10xf32>
      %c0_63 = arith.constant 0 : index
      %c0_64 = arith.constant 0 : index
      %c0_65 = arith.constant 0 : index
      %125 = vector.load %arg5[%c0_63, %c0_64, %c0_65] : memref<1x1x10xf32, #tpu.memory_space<vmem>>, vector<1x1x10xf32>
      tpu.vector_store %arg5[%c0_63, %c0_64, %c0_65], %124 {strides = array<i32>} : memref<1x1x10xf32, #tpu.memory_space<vmem>>, vector<1x1x10xf32>,
      %cst_66 = arith.constant 0.000000e+00 : f32
      %126 = vector.broadcast %cst_66 : f32 to vector<1x1x10xf32>
      %c0_67 = arith.constant 0 : index
      %c0_68 = arith.constant 0 : index
      %c0_69 = arith.constant 0 : index
      %127 = vector.load %arg6[%c0_67, %c0_68, %c0_69] : memref<1x1x10xf32, #tpu.memory_space<vmem>>, vector<1x1x10xf32>
      tpu.vector_store %arg6[%c0_67, %c0_68, %c0_69], %126 {strides = array<i32>} : memref<1x1x10xf32, #tpu.memory_space<vmem>>, vector<1x1x10xf32>,
      %cst_70 = arith.constant 0.000000e+00 : f32
      %128 = vector.broadcast %cst_70 : f32 to vector<1x1x10xf32>
      %c0_71 = arith.constant 0 : index
      %c0_72 = arith.constant 0 : index
      %c0_73 = arith.constant 0 : index
      %129 = vector.load %arg7[%c0_71, %c0_72, %c0_73] : memref<1x1x10xf32, #tpu.memory_space<vmem>>, vector<1x1x10xf32>
      tpu.vector_store %arg7[%c0_71, %c0_72, %c0_73], %128 {strides = array<i32>} : memref<1x1x10xf32, #tpu.memory_space<vmem>>, vector<1x1x10xf32>,
      %cst_74 = arith.constant 0.000000e+00 : f32
      %130 = vector.broadcast %cst_74 : f32 to vector<1x1x128xf32>
      %c0_75 = arith.constant 0 : index
      %c0_76 = arith.constant 0 : index
      %c0_77 = arith.constant 0 : index
      %131 = vector.load %arg8[%c0_75, %c0_76, %c0_77] : memref<1x1x128xf32, #tpu.memory_space<vmem>>, vector<1x1x128xf32>
      tpu.vector_store %arg8[%c0_75, %c0_76, %c0_77], %130 {strides = array<i32>} : memref<1x1x128xf32, #tpu.memory_space<vmem>>, vector<1x1x128xf32>,
    } else {
    }
    %c1_i32 = arith.constant 1 : i32
    %3 = arith.muli %arg0, %c1_i32 : i32
    %4 = arith.addi %3, %arg1 : i32
    %c8_i32 = arith.constant 8 : i32
    %5 = arith.muli %4, %c8_i32 : i32
    %6 = tpu.iota {dimensions = array<i32: 0>} : vector<8x1xi32>
    %7 = vector.broadcast %5 : i32 to vector<8x1xi32>
    %8 = arith.addi %7, %6 : vector<8x1xi32>
    %c12_i32 = arith.constant 12 : i32
    %9 = vector.broadcast %c12_i32 : i32 to vector<8x1xi32>
    %10 = arith.cmpi slt, %8, %9 : vector<8x1xi32>
    %11 = arith.extui %10 : vector<8x1xi1> to vector<8x1xi32>
    %12 = arith.sitofp %11 : vector<8x1xi32> to vector<8x1xf32>
    %c0 = arith.constant 0 : index
    %c0_1 = arith.constant 0 : index
    %13 = vector.load %arg2[%c0, %c0_1] : memref<8x10xf32, #tpu.memory_space<vmem>>, vector<8x10xf32>
    %cst = arith.constant 0.000000e+00 : f32
    %14 = vector.shape_cast %10 : vector<8x1xi1> to vector<8x1xi1>
    %15 = vector.broadcast %14 : vector<8x1xi1> to vector<8x10xi1>
    %16 = vector.broadcast %cst : f32 to vector<8x10xf32>
    %17 = arith.select %15, %13, %16 : vector<8x10xi1>, vector<8x10xf32>
    %c0_2 = arith.constant 0 : index
    %c0_3 = arith.constant 0 : index
    %18 = vector.load %arg3[%c0_2, %c0_3] : memref<8x10xf32, #tpu.memory_space<vmem>>, vector<8x10xf32>
    %cst_4 = arith.constant 0.000000e+00 : f32
    %19 = vector.shape_cast %10 : vector<8x1xi1> to vector<8x1xi1>
    %20 = vector.broadcast %19 : vector<8x1xi1> to vector<8x10xi1>
    %21 = vector.broadcast %cst_4 : f32 to vector<8x10xf32>
    %22 = arith.select %20, %18, %21 : vector<8x10xi1>, vector<8x10xf32>
    %cst_5 = arith.constant dense<0xFF800000> : vector<8xf32>
    %23 = vector.multi_reduction <maximumf>, %17, %cst_5 [1] : vector<8x10xf32> to vector<8xf32>
    %24 = vector.shape_cast %23 : vector<8xf32> to vector<8x1xf32>
    %25 = vector.broadcast %24 : vector<8x1xf32> to vector<8x10xf32>
    %26 = arith.subf %17, %25 : vector<8x10xf32>
    %27 = math.exp %26 : vector<8x10xf32>
    %cst_6 = arith.constant dense<0.000000e+00> : vector<8xf32>
    %28 = vector.multi_reduction <add>, %27, %cst_6 [1] : vector<8x10xf32> to vector<8xf32>
    %29 = vector.shape_cast %28 : vector<8xf32> to vector<8x1xf32>
    %30 = vector.broadcast %29 : vector<8x1xf32> to vector<8x10xf32>
    %31 = arith.divf %27, %30 : vector<8x10xf32>
    %cst_7 = arith.constant dense<0xFF800000> : vector<8xf32>
    %32 = vector.multi_reduction <maximumf>, %22, %cst_7 [1] : vector<8x10xf32> to vector<8xf32>
    %33 = vector.shape_cast %32 : vector<8xf32> to vector<8x1xf32>
    %34 = vector.broadcast %33 : vector<8x1xf32> to vector<8x10xf32>
    %35 = arith.subf %22, %34 : vector<8x10xf32>
    %36 = math.exp %35 : vector<8x10xf32>
    %cst_8 = arith.constant dense<0.000000e+00> : vector<8xf32>
    %37 = vector.multi_reduction <add>, %36, %cst_8 [1] : vector<8x10xf32> to vector<8xf32>
    %38 = vector.shape_cast %37 : vector<8xf32> to vector<8x1xf32>
    %39 = vector.broadcast %38 : vector<8x1xf32> to vector<8x10xf32>
    %40 = arith.divf %36, %39 : vector<8x10xf32>
    %41 = arith.mulf %31, %40 : vector<8x10xf32>
    %cst_9 = arith.constant dense<0.000000e+00> : vector<8xf32>
    %42 = vector.multi_reduction <add>, %41, %cst_9 [1] : vector<8x10xf32> to vector<8xf32>
    %43 = vector.shape_cast %42 : vector<8xf32> to vector<8x1xf32>
    %44 = math.log %43 : vector<8x1xf32>
    %45 = arith.mulf %12, %44 : vector<8x1xf32>
    %46 = arith.mulf %17, %22 : vector<8x10xf32>
    %cst_10 = arith.constant dense<0.000000e+00> : vector<8xf32>
    %47 = vector.multi_reduction <add>, %46, %cst_10 [1] : vector<8x10xf32> to vector<8xf32>
    %48 = vector.shape_cast %47 : vector<8xf32> to vector<8x1xf32>
    %49 = arith.mulf %17, %17 : vector<8x10xf32>
    %cst_11 = arith.constant dense<0.000000e+00> : vector<8xf32>
    %50 = vector.multi_reduction <add>, %49, %cst_11 [1] : vector<8x10xf32> to vector<8xf32>
    %51 = vector.shape_cast %50 : vector<8xf32> to vector<8x1xf32>
    %cst_12 = arith.constant 1.000000e-24 : f32
    %52 = vector.broadcast %cst_12 : f32 to vector<8x1xf32>
    %53 = arith.maximumf %51, %52 : vector<8x1xf32>
    %54 = math.rsqrt %53 : vector<8x1xf32>
    %55 = arith.mulf %22, %22 : vector<8x10xf32>
    %cst_13 = arith.constant dense<0.000000e+00> : vector<8xf32>
    %56 = vector.multi_reduction <add>, %55, %cst_13 [1] : vector<8x10xf32> to vector<8xf32>
    %57 = vector.shape_cast %56 : vector<8xf32> to vector<8x1xf32>
    %cst_14 = arith.constant 1.000000e-24 : f32
    %58 = vector.broadcast %cst_14 : f32 to vector<8x1xf32>
    %59 = arith.maximumf %57, %58 : vector<8x1xf32>
    %60 = math.rsqrt %59 : vector<8x1xf32>
    %cst_15 = arith.constant 2.000000e+00 : f32
    %61 = vector.broadcast %cst_15 : f32 to vector<8x1xf32>
    %62 = arith.mulf %61, %48 : vector<8x1xf32>
    %63 = arith.mulf %62, %54 : vector<8x1xf32>
    %64 = arith.mulf %63, %60 : vector<8x1xf32>
    %cst_16 = arith.constant 2.000000e+00 : f32
    %65 = vector.broadcast %cst_16 : f32 to vector<8x1xf32>
    %66 = arith.subf %64, %65 : vector<8x1xf32>
    %cst_17 = arith.constant 2.000000e+00 : f32
    %67 = vector.broadcast %cst_17 : f32 to vector<8x1xf32>
    %68 = arith.mulf %66, %67 : vector<8x1xf32>
    %69 = math.exp %68 : vector<8x1xf32>
    %cst_18 = arith.constant dense<0.000000e+00> : vector<1xf32>
    %70 = vector.multi_reduction <add>, %45, %cst_18 [0] : vector<8x1xf32> to vector<1xf32>
    %71 = vector.shape_cast %70 : vector<1xf32> to vector<1x1xf32>
    %72 = arith.mulf %69, %45 : vector<8x1xf32>
    %cst_19 = arith.constant dense<0.000000e+00> : vector<1xf32>
    %73 = vector.multi_reduction <add>, %72, %cst_19 [0] : vector<8x1xf32> to vector<1xf32>
    %74 = vector.shape_cast %73 : vector<1xf32> to vector<1x1xf32>
    %75 = vector.broadcast %12 : vector<8x1xf32> to vector<8x10xf32>
    %76 = arith.mulf %31, %75 : vector<8x10xf32>
    %77 = vector.broadcast %12 : vector<8x1xf32> to vector<8x10xf32>
    %78 = arith.mulf %40, %77 : vector<8x10xf32>
    %c0_20 = arith.constant 0 : index
    %c0_21 = arith.constant 0 : index
    %c0_22 = arith.constant 0 : index
    %79 = vector.load %arg4[%c0_20, %c0_21, %c0_22] : memref<1x10x10xf32, #tpu.memory_space<vmem>>, vector<1x10x10xf32>
    %cst_23 = arith.constant dense<0.000000e+00> : vector<10x10xf32>
    %80 = tpu.matmul %76, %78, %cst_23 {dimension_numbers = #tpu.dot_dimension_numbers<[0], [0], [1], [1], [0, 1, 1, 1], [], []>} : vector<8x10xf32>, vector<8x10xf32>, vector<10x10xf32> -> vector<10x10xf32>
    %81 = vector.shape_cast %80 : vector<10x10xf32> to vector<1x10x10xf32>
    %82 = arith.addf %79, %81 : vector<1x10x10xf32>
    %c0_24 = arith.constant 0 : index
    %c0_25 = arith.constant 0 : index
    %c0_26 = arith.constant 0 : index
    %83 = vector.load %arg4[%c0_24, %c0_25, %c0_26] : memref<1x10x10xf32, #tpu.memory_space<vmem>>, vector<1x10x10xf32>
    tpu.vector_store %arg4[%c0_24, %c0_25, %c0_26], %82 {strides = array<i32>} : memref<1x10x10xf32, #tpu.memory_space<vmem>>, vector<1x10x10xf32>,
    %c0_27 = arith.constant 0 : index
    %c0_28 = arith.constant 0 : index
    %c0_29 = arith.constant 0 : index
    %84 = vector.load %arg5[%c0_27, %c0_28, %c0_29] : memref<1x1x10xf32, #tpu.memory_space<vmem>>, vector<1x1x10xf32>
    %cst_30 = arith.constant dense<0.000000e+00> : vector<10xf32>
    %85 = vector.multi_reduction <add>, %76, %cst_30 [0] : vector<8x10xf32> to vector<10xf32>
    %86 = vector.shape_cast %85 : vector<10xf32> to vector<1x10xf32>
    %87 = vector.shape_cast %86 : vector<1x10xf32> to vector<1x1x10xf32>
    %88 = arith.addf %84, %87 : vector<1x1x10xf32>
    %c0_31 = arith.constant 0 : index
    %c0_32 = arith.constant 0 : index
    %c0_33 = arith.constant 0 : index
    %89 = vector.load %arg5[%c0_31, %c0_32, %c0_33] : memref<1x1x10xf32, #tpu.memory_space<vmem>>, vector<1x1x10xf32>
    tpu.vector_store %arg5[%c0_31, %c0_32, %c0_33], %88 {strides = array<i32>} : memref<1x1x10xf32, #tpu.memory_space<vmem>>, vector<1x1x10xf32>,
    %c0_34 = arith.constant 0 : index
    %c0_35 = arith.constant 0 : index
    %c0_36 = arith.constant 0 : index
    %90 = vector.load %arg6[%c0_34, %c0_35, %c0_36] : memref<1x1x10xf32, #tpu.memory_space<vmem>>, vector<1x1x10xf32>
    %91 = arith.mulf %76, %76 : vector<8x10xf32>
    %cst_37 = arith.constant dense<0.000000e+00> : vector<10xf32>
    %92 = vector.multi_reduction <add>, %91, %cst_37 [0] : vector<8x10xf32> to vector<10xf32>
    %93 = vector.shape_cast %92 : vector<10xf32> to vector<1x10xf32>
    %94 = vector.shape_cast %93 : vector<1x10xf32> to vector<1x1x10xf32>
    %95 = arith.addf %90, %94 : vector<1x1x10xf32>
    %c0_38 = arith.constant 0 : index
    %c0_39 = arith.constant 0 : index
    %c0_40 = arith.constant 0 : index
    %96 = vector.load %arg6[%c0_38, %c0_39, %c0_40] : memref<1x1x10xf32, #tpu.memory_space<vmem>>, vector<1x1x10xf32>
    tpu.vector_store %arg6[%c0_38, %c0_39, %c0_40], %95 {strides = array<i32>} : memref<1x1x10xf32, #tpu.memory_space<vmem>>, vector<1x1x10xf32>,
    %c0_41 = arith.constant 0 : index
    %c0_42 = arith.constant 0 : index
    %c0_43 = arith.constant 0 : index
    %97 = vector.load %arg7[%c0_41, %c0_42, %c0_43] : memref<1x1x10xf32, #tpu.memory_space<vmem>>, vector<1x1x10xf32>
    %98 = arith.mulf %78, %78 : vector<8x10xf32>
    %cst_44 = arith.constant dense<0.000000e+00> : vector<10xf32>
    %99 = vector.multi_reduction <add>, %98, %cst_44 [0] : vector<8x10xf32> to vector<10xf32>
    %100 = vector.shape_cast %99 : vector<10xf32> to vector<1x10xf32>
    %101 = vector.shape_cast %100 : vector<1x10xf32> to vector<1x1x10xf32>
    %102 = arith.addf %97, %101 : vector<1x1x10xf32>
    %c0_45 = arith.constant 0 : index
    %c0_46 = arith.constant 0 : index
    %c0_47 = arith.constant 0 : index
    %103 = vector.load %arg7[%c0_45, %c0_46, %c0_47] : memref<1x1x10xf32, #tpu.memory_space<vmem>>, vector<1x1x10xf32>
    tpu.vector_store %arg7[%c0_45, %c0_46, %c0_47], %102 {strides = array<i32>} : memref<1x1x10xf32, #tpu.memory_space<vmem>>, vector<1x1x10xf32>,
    %104 = tpu.iota {dimensions = array<i32: 1>} : vector<1x128xi32>
    %c0_48 = arith.constant 0 : index
    %c0_49 = arith.constant 0 : index
    %c0_50 = arith.constant 0 : index
    %105 = vector.load %arg8[%c0_48, %c0_49, %c0_50] : memref<1x1x128xf32, #tpu.memory_space<vmem>>, vector<1x1x128xf32>
    %c0_i32_51 = arith.constant 0 : i32
    %106 = vector.broadcast %c0_i32_51 : i32 to vector<1x128xi32>
    %107 = arith.cmpi eq, %104, %106 : vector<1x128xi32>
    %cst_52 = arith.constant 0.000000e+00 : f32
    %108 = vector.shape_cast %71 : vector<1x1xf32> to vector<1x1xf32>
    %109 = vector.broadcast %108 : vector<1x1xf32> to vector<1x128xf32>
    %110 = vector.broadcast %cst_52 : f32 to vector<1x128xf32>
    %111 = arith.select %107, %109, %110 : vector<1x128xi1>, vector<1x128xf32>
    %c1_i32_53 = arith.constant 1 : i32
    %112 = vector.broadcast %c1_i32_53 : i32 to vector<1x128xi32>
    %113 = arith.cmpi eq, %104, %112 : vector<1x128xi32>
    %cst_54 = arith.constant 0.000000e+00 : f32
    %114 = vector.shape_cast %74 : vector<1x1xf32> to vector<1x1xf32>
    %115 = vector.broadcast %114 : vector<1x1xf32> to vector<1x128xf32>
    %116 = vector.broadcast %cst_54 : f32 to vector<1x128xf32>
    %117 = arith.select %113, %115, %116 : vector<1x128xi1>, vector<1x128xf32>
    %118 = arith.addf %111, %117 : vector<1x128xf32>
    %119 = vector.shape_cast %118 : vector<1x128xf32> to vector<1x1x128xf32>
    %120 = arith.addf %105, %119 : vector<1x1x128xf32>
    %c0_55 = arith.constant 0 : index
    %c0_56 = arith.constant 0 : index
    %c0_57 = arith.constant 0 : index
    %121 = vector.load %arg8[%c0_55, %c0_56, %c0_57] : memref<1x1x128xf32, #tpu.memory_space<vmem>>, vector<1x1x128xf32>
    tpu.vector_store %arg8[%c0_55, %c0_56, %c0_57], %120 {strides = array<i32>} : memref<1x1x128xf32, #tpu.memory_space<vmem>>, vector<1x1x128xf32>,
    return
  }
  func.func @transform_0(%arg0: i32, %arg1: i32) -> (i32, i32) {
    %c1_i32 = arith.constant 1 : i32
    %0 = arith.muli %arg0, %c1_i32 : i32
    %1 = arith.addi %0, %arg1 : i32
    %c1_i32_0 = arith.constant 1 : i32
    %2 = arith.minsi %1, %c1_i32_0 : i32
    %c0_i32 = arith.constant 0 : i32
    %c0_i32_1 = arith.constant 0 : i32
    return %2, %c0_i32 : i32, i32
  }
  func.func @transform_1(%arg0: i32, %arg1: i32) -> (i32, i32) {
    %c1_i32 = arith.constant 1 : i32
    %0 = arith.muli %arg0, %c1_i32 : i32
    %1 = arith.addi %0, %arg1 : i32
    %c1_i32_0 = arith.constant 1 : i32
    %2 = arith.minsi %1, %c1_i32_0 : i32
    %c0_i32 = arith.constant 0 : i32
    %c0_i32_1 = arith.constant 0 : i32
    return %2, %c0_i32 : i32, i32
  }
  func.func @transform_2(%arg0: i32, %arg1: i32) -> (i32, i32, i32) {
    %c0_i32 = arith.constant 0 : i32
    %c0_i32_0 = arith.constant 0 : i32
    %c0_i32_1 = arith.constant 0 : i32
    return %arg0, %c0_i32, %c0_i32_0 : i32, i32, i32
  }
  func.func @transform_3(%arg0: i32, %arg1: i32) -> (i32, i32, i32) {
    %c0_i32 = arith.constant 0 : i32
    %c0_i32_0 = arith.constant 0 : i32
    %c0_i32_1 = arith.constant 0 : i32
    return %arg0, %c0_i32, %c0_i32_0 : i32, i32, i32
  }
  func.func @transform_4(%arg0: i32, %arg1: i32) -> (i32, i32, i32) {
    %c0_i32 = arith.constant 0 : i32
    %c0_i32_0 = arith.constant 0 : i32
    %c0_i32_1 = arith.constant 0 : i32
    return %arg0, %c0_i32, %c0_i32_0 : i32, i32, i32
  }
  func.func @transform_5(%arg0: i32, %arg1: i32) -> (i32, i32, i32) {
    %c0_i32 = arith.constant 0 : i32
    %c0_i32_0 = arith.constant 0 : i32
    %c0_i32_1 = arith.constant 0 : i32
    return %arg0, %c0_i32, %c0_i32_0 : i32, i32, i32
  }
  func.func @transform_6(%arg0: i32, %arg1: i32) -> (i32, i32, i32) {
    %c0_i32 = arith.constant 0 : i32
    %c0_i32_0 = arith.constant 0 : i32
    %c0_i32_1 = arith.constant 0 : i32
    return %arg0, %c0_i32, %c0_i32_0 : i32, i32, i32
  }
}

</mosaic_0001>

<bundles_post_ra>
// kernel: tpu_custom_call.1
= control target key start
LH: loop header
LB: loop body
LE: loop exit
PB: predicated region body
PF: predicated region fallthrough
CT: control target
= control target key end

     0   :  { %s1718_s0 = inlined_call_operand.hbm [shape: f32[12,10], index: 0, kind: input, shape index: {}]   ;;  %s1719_s1 = inlined_call_operand.hbm [shape: f32[12,10], index: 1, kind: input, shape index: {}]   ;;  %s1720_s2 = inlined_call_operand.vmem [shape: f32[2,10,10], index: 2, kind: output, shape index: {0}]   ;;  %s1721_s3 = inlined_call_operand.hbm [shape: f32[2,1,10], index: 3, kind: output, shape index: {1}]   ;;  %s1722_s4 = inlined_call_operand.hbm [shape: f32[2,1,10], index: 4, kind: output, shape index: {2}]   ;;  %s1723_s5 = inlined_call_operand.hbm [shape: f32[2,1,10], index: 5, kind: output, shape index: {3}]   ;;  %s1724_s6 = inlined_call_operand.hbm [shape: f32[2,1,128], index: 6, kind: output, shape index: {4}]  }
   0x1   :  { %1729 = sst [smem:[#allocation23_spill]] %s1718_s0 }
   0x2   :  { %1730 = sst [smem:[#allocation24_spill]] %s1719_s1 }
   0x3   :  { %1731 = sst [smem:[#allocation25_spill]] %s1720_s2 }
   0x4   :  { %12 = vsyncpa [#allocation3], 0 }
   0x5   :  { %14 = vsyncpa [#allocation3 + $0x1], 0 }
   0x6   :  { %15 = vsyncpa [#allocation6], 0 }
   0x7   :  { %17 = vsyncpa [#allocation6 + $0x1], 0 }
   0x8   :  { %18 = vsyncpa [#allocation4], 0 }
   0x9   :  { %20 = vsyncpa [#allocation4 + $0x1], 0 }
   0xa   :  { %21 = vsyncpa [#allocation9], 0 }
   0xb   :  { %23 = vsyncpa [#allocation9 + $0x1], 0 }
   0xc   :  { %24 = vsyncpa [#allocation12], 0 }
   0xd   :  { %26 = vsyncpa [#allocation12 + $0x1], 0  ;;  %s1360_s21 = smov 0   ;;  %s1362_s22 = smov 0  }
   0xe   :  { %s1364_s23 = smov 0   ;;  %s1366_s24 = smov 0  }
   0xf   :  { %s1368_s25 = smov 0   ;;  %s1370_s26 = smov 0  }
  0x10   :  { %s1372_s27 = smov 0   ;;  %s1374_s28 = smov 0  }
  0x11   :  { %s1376_s29 = smov 0  }
  0x12 LB: > { %1732 = sst [smem:[#allocation18_spill]] %s1304_s26  ;;  %s1404_s30 = sadd.s32 4294967295, %s1316_s29   ;;  %s1316_s29 = sphi %s1376_s29, %s32_s29   ;;  %s1312_s28 = sphi %s1374_s28, %s1752_s28   ;;  %s1308_s27 = sphi %s1372_s27, %s1751_s27   ;;  %s1304_s26 = sphi %s1370_s26, %s1750_s26   ;;  %s1300_s25 = sphi %s1368_s25, %s1757_s25   ;;  %s1296_s24 = sphi %s1366_s24, %s1756_s24   ;;  %s1292_s23 = sphi %s1364_s23, %s1755_s23   ;;  %s1288_s22 = sphi %s1362_s22, %s1754_s22   ;;  %s1284_s21 = sphi %s1360_s21, %s1753_s21  }
  0x13   : > { %1733 = sst [smem:[#allocation19_spill]] %s1312_s28  ;;  %s1725_s7 = sadd.s32 4294967294, %s1316_s29  }
  0x14   : > { %s44_s8 = sadd.s32 1, %s1312_s28  ;;  %p49_p0 = scmp.lt.s32.totalorder %s1312_s28, 1 }
  0x15   : > { %p46_p1 = scmp.ge.s32.totalorder %s44_s8, 2  ;;  %s57_s9 = sadd.s32 1, %s1304_s26 }
  0x16   : > { %s1411_s10 = scalar_select %p49_p0, %s1312_s28, 1 }
  0x17   : > { %s1759_s8 = smov (%p46_p1, %s44_s8), 0  ;;  %p64_p2 = scmp.ne.s32.totalorder %s1304_s26, %s1300_s25 }
  0x18   : > { %1734 = sst [smem:[#allocation20_spill]] %s1759_s8  ;;  %p65_p3 = scmp.eq.s32.totalorder %s1316_s29, 0 }
  0x19   : > { %p52_p4 = scmp.lt.s32.totalorder %s1759_s8, 1  ;;  %p70_p5 = scmp.ne.s32.totalorder %s1300_s25, %s1296_s24 }
  0x1a   : > { %p1420_p6 = por %p65_p3, %p64_p2  ;;  %p71_p7 = scmp.eq.s32.totalorder %s1404_s30, 0 }
  0x1b   : > { %s53_s12 = scalar_select %p52_p4, %s1759_s8, 1 }
  0x1c   : > { %p1426_p8 = por %p71_p7, %p70_p5  ;;  %s138_s14 = ssub.s32 %s1312_s28, %s1759_s8 }
  0x1d   : > { %s54_s15 = ssub.s32 %s1411_s10, %s53_s12  ;;  %p139_p9 = scmp.eq.s32.totalorder %s138_s14, 0 }
  0x1e   : > { %p55_p10 = scmp.eq.s32.totalorder %s54_s15, 0  ;;  %s141_s16 = sadd.s32 1, %s1292_s23 }
  0x1f   : > { %s1435_s17 = scalar_select %p139_p9, %s1292_s23, %s141_s16  }
  0x20   : > { %s1438_s18 = scalar_select %p55_p10, %s1304_s26, %s57_s9  }
  0x21   : > { %1737 = sst [smem:[#allocation21_spill]] %s1435_s17  ;;  %p151_p11 = scmp.ne.s32.totalorder %s1292_s23, %s1288_s22 }
  0x22   : > { %1738 = sst [smem:[#allocation22_spill]] %s1438_s18  ;;  %p152_p12 = scmp.eq.s32.totalorder %s1404_s30, 1 }
  0x23   : > { %p157_p13 = scmp.ne.s32.totalorder %s1288_s22, %s1284_s21  ;;  %p158_p0 = scmp.eq.s32.totalorder %s1725_s7, 1 }
  0x24   : > { %p1447_p1 = por %p152_p12, %p151_p11  ;;  %p975_p4 = scmp.lt.s32.totalorder %s1316_s29, 2 }
  0x25   : > { %p1452_p3 = por %p158_p0, %p157_p13  ;;  %s1458_s24 = sand.u32 1, %s1304_s26  }
  0x26   : > { %s915_s9 = sshll.u32 %s1411_s10, 7  ;;  %s914_s12 = sshll.u32 %s1458_s24, 3 }
  0x27   : > { %s1741_s0 = sld [smem:[#allocation23_spill]]  ;;  %s260_s7 = scalar_lea.vmem [#allocation2], %s914_s12 }
  0x28   : > { %s270_s8 = sshll.u32 %s260_s7, 4  ;;  %p1467_p5 = pnand %p975_p4, %p1420_p6  ;;  %s271_s8 = int_to_ptr.vmem [resolvable:$true] %s270_s8 }
  0x29   : > { %p918_p7 = scmp.ge.s32.totalorder %s1316_s29, 1  ;;  %p296_p9 = scmp.lt.s32.totalorder %s1316_s29, 3 }
  0x2a   : > { %s257_s18 = scalar_lea.sflag [#allocation3], %s1458_s24  ;;  %p1068_p10 = pneg %p1467_p5 }
  0x2b   : > { %s1079_s10 = scalar_lea.vmem %s271_s8, 128  ;;  %s1318_s7 = smov [#allocation2]  }
  0x2c   : > { %p1080_p11 = scmp.ne.s32.totalorder %s271_s8, %s1079_s10  ;;  %s1084_s11 = sshll.u32 %s1318_s7, 4  ;;  %s1085_s11 = int_to_ptr.vmem [resolvable:$false] %s1084_s11 }
  0x2d   : > { %s268_s16 = scalar_lea.hbm %s1741_s0, %s915_s9  ;;  %s1086_s14 = scalar_lea.vmem %s1085_s11, 256 }
  0x2e   : > { %p1082_p12 = pnand %p1080_p11, %p1068_p10  ;;  %p1087_p6 = scmp.lt.s32.totalorder %s271_s8, %s1085_s11 }
  0x2f   : > { %p1088_p0 = scmp.lt.s32.totalorder %s1086_s14, %s1079_s10 }
  0x30   : > { %p1083_p13 = pneg %p1082_p12 }
  0x31   : > { %p1089_p4 = por %p1088_p0, %p1087_p6 }
  0x33   : > { %p1090_p2 = pnand %p1089_p4, %p1083_p13 }
  0x35   : > { %1093 = shalt.err (!%p1090_p2)
}
  0x36   : > { %958 = dma.hbm_to_vmem [thread:$0]  (!%p1467_p5), %s268_s16, 128, %s271_s8, %s257_s18  }
  0x37   : > { %p1485_p11 = pnand %p918_p7, %p296_p9  ;;  %s1744_s1 = sld [smem:[#allocation24_spill]] }
  0x38   : > { %s281_s11 = scalar_lea.vmem [#allocation5], %s914_s12  ;;  %s278_s26 = scalar_lea.sflag [#allocation6], %s1458_s24 }
  0x39   : > { %s291_s14 = sshll.u32 %s281_s11, 4  ;;  %s1319_s8 = smov [#allocation5]   ;;  %s292_s14 = int_to_ptr.vmem [resolvable:$true] %s291_s14 }
  0x3a   : > { %s1107_s17 = scalar_lea.vmem %s292_s14, 128  ;;  %s1112_s18 = sshll.u32 %s1319_s8, 4  ;;  %s1113_s18 = int_to_ptr.vmem [resolvable:$false] %s1112_s18 }
  0x3b   : > { %p1108_p2 = scmp.ne.s32.totalorder %s292_s14, %s1107_s17  ;;  %s1114_s16 = scalar_lea.vmem %s1113_s18, 256 }
  0x3c   : > { %p1115_p7 = scmp.lt.s32.totalorder %s292_s14, %s1113_s18  ;;  %p1116_p9 = scmp.lt.s32.totalorder %s1114_s16, %s1107_s17 }
  0x3d   : > { %s289_s10 = scalar_lea.hbm %s1744_s1, %s915_s9  ;;  %p1110_p12 = pnand %p1108_p2, %p1068_p10 }
  0x3e   : > { %p1117_p6 = por %p1116_p9, %p1115_p7 }
  0x3f   : > { %p1111_p13 = pneg %p1110_p12 }
  0x41   : > { %p1118_p0 = pnand %p1117_p6, %p1111_p13 }
  0x43   : > { %1121 = shalt.err (!%p1118_p0)
}
  0x44   : > { %961 = dma.hbm_to_vmem [thread:$0]  (!%p1467_p5), %s289_s10, 128, %s292_s14, %s278_s26  }
  0x45   : > { %300 = sbr.rel (%p1485_p11) target bundleno = 726 (0x2d6), region = 28  ;;  %s302_s0 = sand.u32 (!%p1485_p11), 1, %s1300_s25  }
  0x46   : > { %s919_s24 = sshll.u32 (!%p1485_p11), %s302_s0, 3  ;;  %s303_s9 = scalar_lea.sflag (!%p1485_p11), [#allocation3], %s302_s0 }
  0x47   : > { %s306_s12 = scalar_lea.vmem (!%p1485_p11), [#allocation2], %s919_s24 }
  0x4a   : > { %1263 = dma.done.wait (%p1426_p8), %s303_s9, 128  }
  0x4b   : > { %1265 = vsyncadd (%p1426_p8), %s303_s9, 4294967168  ;;  %s312_s17 = scalar_lea.sflag [#allocation6], %s302_s0  ;;  %s315_s7 = scalar_lea.vmem [#allocation5], %s919_s24 }
  0x4c   : > { %1267 = dma.done.wait (%p1426_p8), %s312_s17, 128  }
  0x4d   : > { %1269 = vsyncadd (%p1426_p8), %s312_s17, 4294967168  ;;  %s923_s26 = sshll.u32 %s1308_s27, 3  ;;  %v391_v0 = vlaneseq  ;;  %vm380_vm0 = vcmask 80896   ;;  %v398_v4 = vld [vmem:[%s306_s12] sm:$0xff]  ;;  %v401_v5 = vld [vmem:[%s315_s7] sm:$0xff]  ;;  %s1521_s28 = sand.u32 1, %s1288_s22  }
  0x4e   : > { %v393_v1 = vstv %s923_s26  ;;  %vm384_vm2 = vcmask 73728   ;;  %s1524_s13 = scalar_lea.vmem [#allocation7], %s1521_s28  ;;  %v1320_v26 = vmov 0.0   ;;  %s1530_s15 = scalar_lea.vmem [#allocation8], %s1521_s28  ;;  %vm382_vm3 = vcmask 74752  }
  0x4f   : > { %v392_v2 = vshrl.u32 %v391_v0, 7  ;;  %385 = vst.msk [vmem:[%s1524_s13] sm:$0x1] %vm384_vm2, %v1320_v26  ;;  %386 = vst.msk [vmem:[%s1530_s15] sm:$0x1] %vm384_vm2, %v1320_v26  ;;  %s1536_s10 = scalar_lea.vmem [#allocation10], %s1521_s28 }
  0x50   : > { %387 = vst.msk [vmem:[%s1536_s10] sm:$0x1] %vm384_vm2, %v1320_v26  ;;  %s1561_s11 = scalar_lea.vmem [#allocation11], %s1521_s28  ;;  %p371_p8 = scmp.lt.s32.totalorder %s1308_s27, 1  ;;  %vm505_vm4 = vcmask 64512  }
  0x51   : > { %v394_v3 = vadd.s32 %v393_v1, %v392_v2  ;;  %388 = vst [vmem:[%s1561_s11] sm:$0x1] %v1320_v26  ;;  %s1745_s2 = sld [smem:[#allocation25_spill]]  ;;  %s644_s24 = sand.u32 1, %s1404_s30  }
  0x52   : > { %s372_s14 = scalar_select %p371_p8, %s1308_s27, 1 }
  0x53   : > { %vm395_vm1 = vcmp.lt.s32.totalorder %v394_v3, 12  ;;  %s1584_s9 = sshll.u32 %s1308_s27, 4  ;;  %s681_s26 = sshll.u32 %s1530_s15, 4  ;;  %s682_s26 = int_to_ptr.vmem [resolvable:$true] %s681_s26 }
  0x54   : > { %v400_v6 = vsel %vm395_vm1, %v398_v4, 0.0  ;;  %v402_v7 = vsel %vm395_vm1, %v401_v5, 0.0  ;;  %v1543_v30 = vsel %vm395_vm1, 1.0, %v1320_v26  ;;  %s934_s8 = sshll.u32 %s372_s14, 4  ;;  %s1590_s7 = scalar_lea.hbm %s1722_s4, %s1584_s9 }
  0x55   : > { %v404_v8 = vsel %vm380_vm0, %v400_v6, -inf  ;;  %v415_v9 = vsel %vm380_vm0, %v402_v7, -inf  ;;  %v437_v20 = vmul.f32 %v400_v6, %v400_v6  ;;  %v443_v22 = vmul.f32 %v402_v7, %v402_v7  ;;  %s1597_s18 = scalar_lea.hbm %s1721_s3, %s1584_s9  ;;  %s1599_s16 = scalar_lea.sflag [#allocation9], %s644_s24 }
  0x56   : > { %405 = vmax.xlane.f32.xlu0 %v404_v8  ;;  %v433_v24 = vmul.f32 %v402_v7, %v400_v6  ;;  %v592_v54 = vld [vmem:[%s1524_s13] sm:$0x1]  ;;  %s1122_s1 = scalar_lea.vmem %s682_s26, 16  ;;  %s1321_s27 = smov [#allocation8]  }
  0x57   : > { %v438_v21 = vsel %vm380_vm0, %v437_v20, 0.0  ;;  %v444_v23 = vsel %vm380_vm0, %v443_v22, 0.0  ;;  %v603_v58 = vld [vmem:[%s1530_s15] sm:$0x1]  ;;  %s1570_s0 = scalar_lea.vmem %s1745_s2, %s934_s8  ;;  %p1123_p5 = scmp.ne.s32.totalorder %s682_s26, %s1122_s1 }
  0x58   : > { %v434_v25 = vsel %vm380_vm0, %v433_v24, 0.0  ;;  %v614_v1 = vld [vmem:[%s1536_s10] sm:$0x1]  ;;  %383 = vst.msk [vmem:[%s1570_s0 + $0x8] sm:$0x3] %vm382_vm3, %v1320_v26  ;;  %s1126_s30 = sshll.u32 %s1321_s27, 4  ;;  %s1127_s30 = int_to_ptr.vmem [resolvable:$false] %s1126_s30 }
  0x59   : > { %381 = vst.msk [vmem:[%s1570_s0] sm:$0xff] %vm380_vm0, %v1320_v26  ;;  %p1124_p10 = pnand %p1123_p5, %p1447_p1  ;;  %s1128_s12 = scalar_lea.vmem %s1127_s30, 32 }
  0x5a   : > { %416 = vmax.xlane.f32.xlu0 %v415_v9  ;;  %p1129_p11 = scmp.lt.s32.totalorder %s682_s26, %s1127_s30  ;;  %p1130_p2 = scmp.lt.s32.totalorder %s1128_s12, %s1122_s1 }
  0x5b   : > { %p1125_p4 = pneg %p1124_p10 }
  0x5c   : > { %p1131_p12 = por %p1130_p2, %p1129_p11 }
  0x5e   : > { %p1132_p13 = pnand %p1131_p12, %p1125_p4 }
  0xdf   : > { %v406_v10 = vpop.xlane.xlu0 %405 }
  0xe0   : > { %v407_v11 = vsub.f32 %v400_v6, %v406_v10 }
  0xe2   : > { %v408_v12 = vmul.f32 1.442695, %v407_v11 }
  0xe3   : > { %v417_v13 = vpop.xlane.xlu0 %416 }
  0xe4   : > { %1050 = vpow2.f32 %v408_v12  ;;  %v418_v14 = vsub.f32 %v402_v7, %v417_v13 }
  0xe6   : > { %v419_v15 = vmul.f32 1.442695, %v418_v14 }
  0xe8   : > { %1052 = vpow2.f32 %v419_v15 }
  0xf1   : > { %v1051_v16 = vpop.eup %1050 }
  0xf2   : > { %v410_v17 = vsel %vm380_vm0, %v1051_v16, 0.0 }
  0xf3   : > { %411 = vadd.xlane.f32.xlu1 %v410_v17 }
  0xf5   : > { %v1053_v18 = vpop.eup %1052 }
  0xf6   : > { %v421_v19 = vsel %vm380_vm0, %v1053_v18, 0.0 }
  0xf7   : > { %422 = vadd.xlane.f32.xlu1 %v421_v19 }
  0xfb   : > { %439 = vadd.xlane.f32.xlu1 %v438_v21 }
  0xff   : > { %445 = vadd.xlane.f32.xlu1 %v444_v23 }
 0x103   : > { %435 = vadd.xlane.f32.xlu1 %v434_v25 }
 0x17c   : > { %v412_v27 = vpop.xlane.xlu1 %411 }
 0x17d   : > { %1054 = vrcp.f32 %v412_v27 }
 0x180   : > { %v423_v28 = vpop.xlane.xlu1 %422 }
 0x181   : > { %1056 = vrcp.f32 %v423_v28 }
 0x184   : > { %v440_v4 = vpop.xlane.xlu1 %439 }
 0x185   : > { %v441_v5 = vmax.f32 %v440_v4, 1e-24 }
 0x187   : > { %1058 = vrsqrt.f32 %v441_v5 }
 0x188   : > { %v446_v6 = vpop.xlane.xlu1 %445 }
 0x189   : > { %v447_v7 = vmax.f32 %v446_v6, 1e-24 }
 0x18a   : > { %v1055_v29 = vpop.eup %1054 }
 0x18b   : > { %v414_v31 = vmul.f32 %v1055_v29, %v1051_v16  ;;  %1060 = vrsqrt.f32 %v447_v7 }
 0x18c   : > { %v436_v8 = vpop.xlane.xlu1 %435 }
 0x18d   : > { %v469_v32 = vmul.f32 %v1543_v30, %v414_v31  ;;  %v449_v9 = vmul.f32 2.0, %v436_v8 }
 0x18e   : > { %v1057_v33 = vpop.eup %1056 }
 0x18f   : > { %473 = vxpose.xlu0.b32.start.end [1/1] (short) (narrow) %v469_v32, 16  ;;  %v593_v34 = vsel %vm380_vm0, %v469_v32, 0.0  ;;  %v604_v35 = vmul.f32 %v469_v32, %v469_v32  ;;  %v425_v36 = vmul.f32 %v1057_v33, %v1053_v18  ;;  %v626_v33 = vand.u32 127, %v391_v0 }
 0x190   : > { %v594_v37 = vrot.slane %v593_v34, 4 }
 0x191   : > { %v605_v38 = vsel %vm380_vm0, %v604_v35, 0.0  ;;  %v470_v39 = vmul.f32 %v1543_v30, %v425_v36  ;;  %v426_v40 = vmul.f32 %v425_v36, %v414_v31  ;;  %vm628_vm5 = vcmp.eq.s32.totalorder %v626_v33, 0 }
 0x192   : > { %v595_v41 = vadd.f32 %v594_v37, %v593_v34  ;;  %v606_v42 = vrot.slane %v605_v38, 4  ;;  %vm630_vm6 = vcmp.eq.s32.totalorder %v626_v33, 1 }
 0x193   : > { %938 = vmatprep.subr.mxu0 %v470_v39  ;;  %v615_v43 = vmul.f32 %v470_v39, %v470_v39  ;;  %v427_v44 = vsel %vm380_vm0, %v426_v40, 0.0 }
 0x194   : > { %v596_v45 = vrot.slane %v595_v41, 2  ;;  %v607_v46 = vadd.f32 %v606_v42, %v605_v38  ;;  %939 = vmatpush3.msra.mxu0 %v470_v39  ;;  %428 = vadd.xlane.f32.xlu1 %v427_v44  ;;  %v1059_v10 = vpop.eup %1058  ;;  %v627_v39 = vld [vmem:[%s1561_s11] sm:$0x1] }
 0x195   : > { %v616_v47 = vsel %vm380_vm0, %v615_v43, 0.0  ;;  %v450_v12 = vmul.f32 %v1059_v10, %v449_v9 }
 0x196   : > { %v597_v48 = vadd.f32 %v596_v45, %v595_v41  ;;  %v608_v49 = vrot.slane %v607_v46, 2  ;;  %v617_v50 = vrot.slane %v616_v47, 4 }
 0x198   : > { %v598_v51 = vrot.slane %v597_v48, 1  ;;  %v609_v52 = vadd.f32 %v608_v49, %v607_v46  ;;  %v618_v53 = vadd.f32 %v617_v50, %v616_v47  ;;  %v1061_v13 = vpop.eup %1060 }
 0x199   : > { %v451_v15 = vmul.f32 %v1061_v13, %v450_v12 }
 0x19a   : > { %v599_v55 = vadd.f32 %v598_v51, %v597_v48  ;;  %v610_v56 = vrot.slane %v609_v52, 1  ;;  %v619_v57 = vrot.slane %v618_v53, 2 }
 0x19b   : > { %v925_v16 = vadd.f32 -2.0, %v451_v15 }
 0x19c   : > { %v611_v59 = vadd.f32 %v610_v56, %v609_v52  ;;  %v620_v60 = vadd.f32 %v619_v57, %v618_v53  ;;  %v600_v61 = vadd.f32 %v599_v55, %v592_v54 }
 0x19d   : > { %v453_v17 = vmul.f32 2.0, %v925_v16 }
 0x19e   : > { %v621_v62 = vrot.slane %v620_v60, 1  ;;  %v612_v63 = vadd.f32 %v611_v59, %v603_v58  ;;  %602 = vst.msk [vmem:[%s1524_s13] sm:$0x1] %vm384_vm2, %v600_v61 }
 0x19f   : > { %v454_v18 = vmul.f32 1.442695, %v453_v17 }
 0x1a0   : > { %v622_v2 = vadd.f32 %v621_v62, %v620_v60  ;;  %613 = vst.msk [vmem:[%s1530_s15] sm:$0x1] %vm384_vm2, %v612_v63 }
 0x1a2   : > { %v623_v3 = vadd.f32 %v622_v2, %v614_v1 }
 0x1a4   : > { %624 = vst.msk [vmem:[%s1536_s10] sm:$0x1] %vm384_vm2, %v623_v3 }
 0x20b   : > { %v489_v11 = vpop.trf.xlu0 }
 0x20c   : > { %940 = vmatprep.mubr.msk.f32.mxu0 %vm505_vm4, %v489_v11 }
 0x20f   : > { %v490_v14 = vpop.trf.xlu0 }
 0x210   : > { %941 = vmatmul.mubr.msk.f32.vlgmr.msra.gmra.mxu0 %vm505_vm4, %v490_v14 }
 0x21d   : > { %v429_v19 = vpop.xlane.xlu1 %428 }
 0x21e   : > { %1062 = vlog2.f32 %v429_v19 }
 0x21f   : > { %1064 = vpow2.f32 %v454_v18 }
 0x22b   : > { %v1063_v20 = vpop.eup %1062 }
 0x22c   : > { %v431_v21 = vmul.f32 0.6931472, %v1063_v20  ;;  %v1065_v22 = vpop.eup %1064 }
 0x22e   : > { %v432_v23 = vmul.f32 %v1543_v30, %v431_v21 }
 0x230   : > { %v456_v24 = vrot.slane %v432_v23, 4  ;;  %v462_v25 = vmul.f32 %v1065_v22, %v432_v23 }
 0x232   : > { %v457_v26 = vadd.f32 %v456_v24, %v432_v23  ;;  %v463_v27 = vrot.slane %v462_v25, 4 }
 0x234   : > { %v458_v28 = vrot.slane %v457_v26, 2  ;;  %v464_v29 = vadd.f32 %v463_v27, %v462_v25 }
 0x236   : > { %v459_v31 = vadd.f32 %v458_v28, %v457_v26  ;;  %v465_v32 = vrot.slane %v464_v29, 2 }
 0x238   : > { %v460_v34 = vrot.slane %v459_v31, 1  ;;  %v466_v35 = vadd.f32 %v465_v32, %v464_v29 }
 0x23a   : > { %v461_v36 = vadd.f32 %v460_v34, %v459_v31  ;;  %v467_v37 = vrot.slane %v466_v35, 1 }
 0x23c   : > { %v468_v30 = vadd.f32 %v467_v37, %v466_v35  ;;  %v629_v38 = vsel %vm628_vm5, %v461_v36, 0.0 }
 0x23e   : > { %v631_v40 = vsel %vm630_vm6, %v468_v30, 0.0 }
 0x23f   : > { %v632_v41 = vadd.f32 %v631_v40, %v629_v38 }
 0x241   : > { %v633_v42 = vadd.f32 %v632_v41, %v627_v39 }
 0x243   : > { %634 = vst [vmem:[%s1561_s11] sm:$0x1] %v633_v42 }
 0x244   : > { %1135 = shalt.err (!%p1132_p13)
}
 0x245   : > { %s1136_s15 = scalar_lea.hbm %s1590_s7, 16  ;;  %s1140_s14 = scalar_lea.hbm %s1722_s4, 32 }
 0x246   : > { %p1137_p7 = scmp.ne.s32.totalorder %s1590_s7, %s1136_s15  ;;  %p1141_p0 = scmp.lt.s32.totalorder %s1590_s7, %s1722_s4 }
 0x247   : > { %p1142_p8 = scmp.lt.s32.totalorder %s1140_s14, %s1136_s15 }
 0x248   : > { %p1138_p9 = pnand %p1137_p7, %p1447_p1 }
 0x249   : > { %p1143_p5 = por %p1142_p8, %p1141_p0 }
 0x24a   : > { %p1139_p6 = pneg %p1138_p9 }
 0x24c   : > { %p1144_p10 = pnand %p1143_p5, %p1139_p6 }
 0x24e   : > { %1147 = shalt.err (!%p1144_p10)
}
 0x24f   : > { %948 = dma.vmem_to_hbm [thread:$0]  (%p1447_p1), %s682_s26, 16, %s1590_s7, %s1599_s16  }
 0x250   : > { %s668_s1 = sshll.u32 %s1524_s13, 4  ;;  %s1623_s24 = scalar_lea.hbm %s1723_s5, %s1584_s9  ;;  %s669_s1 = int_to_ptr.vmem [resolvable:$true] %s668_s1 }
 0x251   : > { %s694_s15 = sshll.u32 %s1536_s10, 4  ;;  %s641_s17 = scalar_lea.sflag [#allocation4], %s1521_s28  ;;  %s695_s15 = int_to_ptr.vmem [resolvable:$true] %s694_s15 }
 0x252   : > { %s1148_s14 = scalar_lea.vmem %s669_s1, 16  ;;  %s1322_s8 = smov [#allocation7]  }
 0x253   : > { %p1149_p4 = scmp.ne.s32.totalorder %s669_s1, %s1148_s14  ;;  %s1152_s27 = sshll.u32 %s1322_s8, 4  ;;  %s1153_s27 = int_to_ptr.vmem [resolvable:$false] %s1152_s27 }
 0x254   : > { %s1154_s2 = scalar_lea.vmem %s1153_s27, 32  ;;  %p1155_p12 = scmp.lt.s32.totalorder %s669_s1, %s1153_s27 }
 0x255   : > { %p1150_p11 = pnand %p1149_p4, %p1447_p1  ;;  %p1156_p13 = scmp.lt.s32.totalorder %s1154_s2, %s1148_s14 }
 0x257   : > { %p1151_p2 = pneg %p1150_p11  ;;  %p1157_p7 = por %p1156_p13, %p1155_p12 }
 0x259   : > { %p1158_p9 = pnand %p1157_p7, %p1151_p2 }
 0x25b   : > { %1161 = shalt.err (!%p1158_p9)
}
 0x25c   : > { %s1162_s13 = scalar_lea.hbm %s1597_s18, 16  ;;  %s1166_s26 = scalar_lea.hbm %s1721_s3, 32 }
 0x25d   : > { %p1163_p6 = scmp.ne.s32.totalorder %s1597_s18, %s1162_s13  ;;  %p1167_p5 = scmp.lt.s32.totalorder %s1597_s18, %s1721_s3 }
 0x25e   : > { %p1168_p10 = scmp.lt.s32.totalorder %s1166_s26, %s1162_s13 }
 0x25f   : > { %p1164_p0 = pnand %p1163_p6, %p1447_p1 }
 0x260   : > { %p1169_p4 = por %p1168_p10, %p1167_p5 }
 0x261   : > { %p1165_p8 = pneg %p1164_p0 }
 0x263   : > { %p1170_p11 = pnand %p1169_p4, %p1165_p8 }
 0x265   : > { %1173 = shalt.err (!%p1170_p11)
}
 0x266   : > { %947 = dma.vmem_to_hbm [thread:$0]  (%p1447_p1), %s669_s1, 16, %s1597_s18, %s641_s17  }
 0x267   : > { %s1174_s2 = scalar_lea.vmem %s695_s15, 16  ;;  %s1323_s14 = smov [#allocation10]  }
 0x268   : > { %p1175_p2 = scmp.ne.s32.totalorder %s695_s15, %s1174_s2  ;;  %s1178_s8 = sshll.u32 %s1323_s14, 4  ;;  %s1179_s8 = int_to_ptr.vmem [resolvable:$false] %s1178_s8 }
 0x269   : > { %s1180_s27 = scalar_lea.vmem %s1179_s8, 32  ;;  %p1181_p7 = scmp.lt.s32.totalorder %s695_s15, %s1179_s8 }
 0x26a   : > { %p1176_p12 = pnand %p1175_p2, %p1447_p1  ;;  %p1182_p9 = scmp.lt.s32.totalorder %s1180_s27, %s1174_s2 }
 0x26c   : > { %p1177_p13 = pneg %p1176_p12  ;;  %p1183_p6 = por %p1182_p9, %p1181_p7 }
 0x26e   : > { %p1184_p0 = pnand %p1183_p6, %p1177_p13 }
 0x270   : > { %1187 = shalt.err (!%p1184_p0)
}
 0x271   : > { %s1188_s18 = scalar_lea.hbm %s1623_s24, 16  ;;  %s1192_s13 = scalar_lea.hbm %s1723_s5, 32 }
 0x272   : > { %p1189_p8 = scmp.ne.s32.totalorder %s1623_s24, %s1188_s18  ;;  %p1193_p4 = scmp.lt.s32.totalorder %s1623_s24, %s1723_s5 }
 0x273   : > { %p1194_p11 = scmp.lt.s32.totalorder %s1192_s13, %s1188_s18 }
 0x274   : > { %p1190_p5 = pnand %p1189_p8, %p1447_p1 }
 0x275   : > { %p1195_p2 = por %p1194_p11, %p1193_p4 }
 0x276   : > { %p1191_p10 = pneg %p1190_p5 }
 0x278   : > { %p1196_p12 = pnand %p1195_p2, %p1191_p10 }
 0x27a   : > { %1199 = shalt.err (!%p1196_p12)
}
 0x27b   : > { %949 = dma.vmem_to_hbm [thread:$0]  (%p1447_p1), %s695_s15, 16, %s1623_s24, %s1599_s16  }
 0x27c   : > { %s705_s12 = scalar_lea.hbm %s1724_s6, %s1584_s9  ;;  %s707_s2 = sshll.u32 %s1561_s11, 4  ;;  %s708_s2 = int_to_ptr.vmem [resolvable:$true] %s707_s2 }
 0x27d   : > { %s653_s14 = scalar_lea.sflag [#allocation12], %s1521_s28  ;;  %s1200_s8 = scalar_lea.vmem %s708_s2, 16 }
 0x27e   : > { %p1201_p13 = scmp.ne.s32.totalorder %s708_s2, %s1200_s8  ;;  %s1324_s27 = smov [#allocation11]  }
 0x27f   : > { %s1204_s18 = sshll.u32 %s1324_s27, 4  ;;  %s1205_s18 = int_to_ptr.vmem [resolvable:$false] %s1204_s18 }
 0x280   : > { %p1202_p7 = pnand %p1201_p13, %p1447_p1  ;;  %s1206_s1 = scalar_lea.vmem %s1205_s18, 32 }
 0x281   : > { %p1207_p6 = scmp.lt.s32.totalorder %s708_s2, %s1205_s18  ;;  %p1208_p0 = scmp.lt.s32.totalorder %s1206_s1, %s1200_s8 }
 0x282   : > { %p1203_p9 = pneg %p1202_p7 }
 0x283   : > { %p1209_p8 = por %p1208_p0, %p1207_p6 }
 0x285   : > { %p1210_p5 = pnand %p1209_p8, %p1203_p9 }
 0x287   : > { %1213 = shalt.err (!%p1210_p5)
}
 0x288   : > { %s1214_s16 = scalar_lea.hbm %s705_s12, 16  ;;  %s1218_s9 = scalar_lea.hbm %s1724_s6, 32 }
 0x289   : > { %p1215_p10 = scmp.ne.s32.totalorder %s705_s12, %s1214_s16  ;;  %p1219_p2 = scmp.lt.s32.totalorder %s705_s12, %s1724_s6 }
 0x28a   : > { %p1220_p12 = scmp.lt.s32.totalorder %s1218_s9, %s1214_s16 }
 0x28b   : > { %p1216_p4 = pnand %p1215_p10, %p1447_p1 }
 0x28c   : > { %p1221_p13 = por %p1220_p12, %p1219_p2 }
 0x28d   : > { %p1217_p11 = pneg %p1216_p4 }
 0x28f   : > { %p1222_p7 = pnand %p1221_p13, %p1217_p11 }
 0x291   : > { %1225 = shalt.err (!%p1222_p7)
}
 0x292   : > { %950 = dma.vmem_to_hbm [thread:$0]  (%p1447_p1), %s708_s2, 16, %s705_s12, %s653_s14   ;;  %v472_v0 = vld [vmem:[%s1570_s0 + $0x8] sm:$0x3]  ;;  %v471_v44 = vld [vmem:[%s1570_s0] sm:$0xff] }
 0x2d0   : > { %v942_v43 = vpop.f32.mrf.mxu0 }
 0x2d1   : > { %v588_v45 = vadd.f32 %v942_v43, %v472_v0 }
 0x2d2   : > { %v578_v46 = vpop.f32.mrf.mxu0 }
 0x2d3   : > { %591 = vst.msk [vmem:[%s1570_s0 + $0x8] sm:$0x3] %vm382_vm3, %v588_v45  ;;  %v587_v47 = vadd.f32 %v578_v46, %v471_v44 }
 0x2d5   : > { %589 = vst.msk [vmem:[%s1570_s0] sm:$0xff] %vm380_vm0, %v587_v47 }
 0x2d6 PF: > { %s727_s19 = sand.u32 1, %s1284_s21   ;;  %p1746_p9 = scmp.ge.s32.totalorder %s1316_s29, 2 }
 0x2d7   : > { %s728_s17 = scalar_lea.sflag [#allocation4], %s727_s19 }
 0x2d8   : > { %p963_p6 = pnand %p1746_p9, %p1452_p3 }
 0x2da   : > { %p964_p0 = pneg %p963_p6 }
 0x2dc   : > { %1271 = dma.done.wait (%p964_p0), %s728_s17, 16  }
 0x2dd   : > { %1273 = vsyncadd (%p964_p0), %s728_s17, 4294967280  ;;  %s1747_s13 = sadd.s32 4294967294, %s1316_s29  }
 0x2de   : > { %s735_s10 = sand.u32 1, %s1747_s13  }
 0x2df   : > { %s736_s7 = scalar_lea.sflag [#allocation9], %s735_s10 }
 0x2e0   : > { %1275 = dma.done.wait (%p964_p0), %s736_s7, 32  }
 0x2e1   : > { %1277 = vsyncadd (%p964_p0), %s736_s7, 4294967264  ;;  %s752_s26 = scalar_lea.sflag [#allocation12], %s727_s19 }
 0x2e2   : > { %1279 = dma.done.wait (%p964_p0), %s752_s26, 16  }
 0x2e3   : > { %1281 = vsyncadd (%p964_p0), %s752_s26, 4294967280  ;;  %s32_s29 = sadd.s32 1, %s1316_s29   ;;  %s1748_s20 = sld [smem:[#allocation21_spill]] }
 0x2e4   : > { %p29_p1 = scmp.ge.s32.totalorder %s32_s29, 4   ;;  %s1749_s0 = sld [smem:[#allocation18_spill]] }
 0x2e5   : > { %s1750_s26 = sld [smem:[#allocation22_spill]]  ;;  %s1753_s21 = smov %s1288_s22 }
 0x2e6   : > { %s1751_s27 = sld [smem:[#allocation19_spill]]  ;;  %s1754_s22 = smov %s1292_s23 }
 0x2e7   : > { %s1752_s28 = sld [smem:[#allocation20_spill]]  ;;  %s1756_s24 = smov %s1300_s25 }
 0x2e8   :  { %31 = sbr.rel (!%p29_p1) target bundleno = 18 (0x12), region = 151 }
 0x2e9   : > { %s1755_s23 = smov %s1748_s20 }
 0x2ea   : > { %s1757_s25 = smov %s1749_s0 }
 0x2ed   :  { %756 = vsyncpa [#allocation3], 1 }
 0x2ee   :  { %758 = vsyncpa [#allocation3 + $0x1], 1 }
 0x2ef   :  { %759 = vsyncpa [#allocation6], 1 }
 0x2f0   :  { %761 = vsyncpa [#allocation6 + $0x1], 1 }
 0x2f1   :  { %762 = vsyncpa [#allocation4], 1 }
 0x2f2   :  { %764 = vsyncpa [#allocation4 + $0x1], 1 }
 0x2f3   :  { %765 = vsyncpa [#allocation9], 1 }
 0x2f4   :  { %767 = vsyncpa [#allocation9 + $0x1], 1 }
 0x2f5   :  { %768 = vsyncpa [#allocation12], 1 }
 0x2f6   :  { %770 = vsyncpa [#allocation12 + $0x1], 1 }

</bundles_post_ra>
